<compile_context>
chip_gen: v7x
topology: tpu7x:2x2x1
jax: 0.10.0
libtpu: 0.0.40
codegen_flags: <defaults>
</compile_context>

<pallas_src>
import functools

import jax
import jax.numpy as jnp
from jax import lax
from jax.experimental import pallas as pl
from jax.experimental.pallas import tpu as pltpu

_VMEM_LIMIT = 64 * 1024 * 1024   # explicit scoped-VMEM budget (v5e default is 16 MiB)


def _round_up(x, m):
    return ((x + m - 1) // m) * m


def _row_tile(M, max_rows):
    """Pick a row-tile that avoids activation padding whenever possible."""
    if M <= max_rows:
        return M, M                       # single full tile, no pad
    t = (max_rows // 8) * 8
    while t >= 8:
        if M % t == 0:
            return t, M                   # divides M, no pad
        t -= 8
    t = (max_rows // 8) * 8               # fallback: pad rows
    return t, _round_up(M, t)


# ---------------------------------------------------------------------------
# GELU via Abramowitz–Stegun erf approximation (max |err| ~1.5e-7 => matches
# the exact-erf nn.GELU of the reference to f32 noise).  exp -> EUP slot.
# ---------------------------------------------------------------------------
def _gelu_exactish(y):
    x = y * 0.7071067811865476
    ax = jnp.abs(x)
    t = 1.0 / (1.0 + 0.3275911 * ax)
    poly = t * (0.254829592 + t * (-0.284496736 + t * (1.421413741
               + t * (-1.453152027 + t * 1.061405429))))
    erf_abs = 1.0 - poly * jnp.exp(-ax * ax)
    erf = jnp.where(x >= 0, erf_abs, -erf_abs)
    return 0.5 * y * (1.0 + erf)


# ---------------------------------------------------------------------------
# Fused (LayerNorm) + Linear + (policy scale) + (GELU) kernel
# Full K and full output-N resident per step; grid only over row tiles.
# ---------------------------------------------------------------------------
def _linear_kernel(*refs, ln, scaled, act, ln_eps):
    x_ref, w_ref, b_ref = refs[0], refs[1], refs[2]
    i = 3
    if ln:
        g_ref, gb_ref = refs[i], refs[i + 1]
        i += 2
    if scaled:
        s_ref = refs[i]
        i += 1
    o_ref = refs[i]

    x = x_ref[...]
    if ln:
        x = x.astype(jnp.float32)
        mu = jnp.mean(x, axis=-1, keepdims=True)
        var = jnp.mean((x - mu) ** 2, axis=-1, keepdims=True)
        x = (x - mu) * lax.rsqrt(var + ln_eps)
        x = x * g_ref[...] + gb_ref[...]

    y = jnp.dot(x.astype(jnp.bfloat16), w_ref[...],
                preferred_element_type=jnp.float32)
    y = y + b_ref[...]
    if scaled:
        y = y * s_ref[...]
    if act == "gelu":
        y = _gelu_exactish(y)
    o_ref[...] = y.astype(o_ref.dtype)


def fused_linear(x2d, w, b, *, gamma=None, beta=None, row_scale=None,
                 act="none", out_dtype=jnp.float32, ln_eps=1e-5, max_rows=512):
    """y = [GELU]((LN(x) @ w + b) * row_scale).  bf16 MXU inputs, f32 math."""
    M, K = x2d.shape
    Kw, N = w.shape
    assert Kw == K
    tm, Mp = _row_tile(M, max_rows)

    xin = x2d
    sin = None
    if row_scale is not None:
        sin = row_scale.reshape(M, 1).astype(jnp.float32)
    if Mp > M:                               # rare fallback; avoided when M % 8 == 0
        xin = jnp.pad(xin, ((0, Mp - M), (0, 0)))
        if sin is not None:
            sin = jnp.pad(sin, ((0, Mp - M), (0, 0)))

    wb = w.astype(jnp.bfloat16)
    bb = b.reshape(1, N).astype(jnp.float32)

    ln = gamma is not None
    scaled = row_scale is not None

    in_specs = [pl.BlockSpec((tm, K), lambda i: (i, 0)),
                pl.BlockSpec((K, N), lambda i: (0, 0)),
                pl.BlockSpec((1, N), lambda i: (0, 0))]
    args = [xin, wb, bb]
    if ln:
        in_specs += [pl.BlockSpec((1, K), lambda i: (0, 0)),
                     pl.BlockSpec((1, K), lambda i: (0, 0))]
        args += [gamma.reshape(1, K).astype(jnp.float32),
                 beta.reshape(1, K).astype(jnp.float32)]
    if scaled:
        in_specs.append(pl.BlockSpec((tm, 1), lambda i: (i, 0)))
        args.append(sin)

    out = pl.pallas_call(
        functools.partial(_linear_kernel, ln=ln, scaled=scaled, act=act,
                          ln_eps=ln_eps),
        out_shape=jax.ShapeDtypeStruct((Mp, N), out_dtype),
        grid=(Mp // tm,),
        in_specs=in_specs,
        out_specs=pl.BlockSpec((tm, N), lambda i: (i, 0)),
        compiler_params=pltpu.CompilerParams(
            dimension_semantics=("parallel",),
            vmem_limit_bytes=_VMEM_LIMIT),
    )(*args)
    return out[:M] if Mp > M else out


# ---------------------------------------------------------------------------
# Fused attention: scores + softmax_with_policy + attn@v + ||v|| per token.
# Reads token-major (B, N, 3C) bf16 qkv directly; per-head stores (no concat).
# ---------------------------------------------------------------------------
def _fused_attn_kernel(qkv_ref, pol_ref, av_ref, a0_ref, vn_ref,
                       *, num_heads, head_dim, scale, eps):
    pol = pol_ref[0]                                    # (1, N) f32
    n = pol.shape[-1]
    C = num_heads * head_dim
    r = lax.broadcasted_iota(jnp.int32, (n, n), 0)
    c = lax.broadcasted_iota(jnp.int32, (n, n), 1)
    attn_policy = jnp.where(r == c, jnp.float32(1.0), pol)   # (N, N)

    vn_acc = jnp.zeros((n, 1), jnp.float32)
    for h in range(num_heads):                          # static, unrolled
        off = h * head_dim
        q = qkv_ref[0, :, pl.ds(off, head_dim)] * scale          # (N, hd) bf16
        k = qkv_ref[0, :, pl.ds(C + off, head_dim)]
        v = qkv_ref[0, :, pl.ds(2 * C + off, head_dim)]

        s = lax.dot_general(q, k, (((1,), (1,)), ((), ())),
                            preferred_element_type=jnp.float32)  # (N, N)
        m = jnp.max(s, axis=-1, keepdims=True)                    # unmasked max
        e = jnp.exp(s - m) * attn_policy
        denom = jnp.sum(e, axis=-1, keepdims=True) + eps
        probs = (e + eps / n) / denom                              # exact divide

        a0_ref[0, pl.ds(h, 1), :] = probs[0:1, :]                  # row 0 -> scores
        ctx = lax.dot_general(probs.astype(jnp.bfloat16), v,
                              (((1,), (0,)), ((), ())),
                              preferred_element_type=jnp.float32)  # (N, hd)
        av_ref[0, :, pl.ds(off, head_dim)] = ctx.astype(av_ref.dtype)

        vf = v.astype(jnp.float32)
        vn_acc = vn_acc + jnp.sum(vf * vf, axis=-1, keepdims=True)
    vn_ref[0] = jnp.sqrt(vn_acc)


def fused_attention(qkv_bnc, pol_b1n, *, num_heads, head_dim, scale, eps=1e-6):
    """qkv_bnc: (B, N, 3C) bf16 token-major; pol_b1n: (B, 1, N) f32.
    Returns: av (B, N, C) bf16 head-interleaved (attn @ v),
             attn0 (B, H, N) f32 (query-row-0 probabilities),
             vnorm (B, N, 1) f32 (||v|| per token)."""
    B, N, threeC = qkv_bnc.shape
    C = num_heads * head_dim
    assert threeC == 3 * C
    # TODO(synk): for v7x (64 MiB VMEM) and long sequences, add a flash-style
    # query-tile grid axis (also gives a second "parallel" axis for megacore).
    return pl.pallas_call(
        functools.partial(_fused_attn_kernel, num_heads=num_heads,
                          head_dim=head_dim, scale=scale, eps=eps),
        out_shape=(jax.ShapeDtypeStruct((B, N, C), jnp.bfloat16),
                   jax.ShapeDtypeStruct((B, num_heads, N), jnp.float32),
                   jax.ShapeDtypeStruct((B, N, 1), jnp.float32)),
        grid=(B,),
        in_specs=[pl.BlockSpec((1, N, threeC), lambda b: (b, 0, 0)),
                  pl.BlockSpec((1, 1, N), lambda b: (b, 0, 0))],
        out_specs=(pl.BlockSpec((1, N, C), lambda b: (b, 0, 0)),
                   pl.BlockSpec((1, num_heads, N), lambda b: (b, 0, 0)),
                   pl.BlockSpec((1, N, 1), lambda b: (b, 0, 0))),
        compiler_params=pltpu.CompilerParams(
            dimension_semantics=("parallel",),
            vmem_limit_bytes=_VMEM_LIMIT),
    )(qkv_bnc, pol_b1n)


# --------------------------- ATS sampling (glue) -----------------------------

def get_unique_indices(indices, max_value):
    sorted_idx = jnp.sort(indices, axis=1)
    shift_left = jnp.pad(sorted_idx[:, 1:], ((0, 0), (0, 1)), constant_values=1)
    unique = jnp.where(shift_left - sorted_idx == 0,
                       jnp.full_like(sorted_idx, max_value), sorted_idx)
    return jnp.sort(unique, axis=1)


def create_ys(normalized_cdf, n_tokens):
    B = normalized_cdf.shape[0]
    ys = jnp.broadcast_to(jnp.linspace(0.0, 1.0, n_tokens - 1)[None, :],
                          (B, n_tokens - 1))
    ys_start = jnp.min(
        normalized_cdf + (normalized_cdf == 0).astype(jnp.float32) * 1e8,
        axis=1)[:, None]
    ys_start = jnp.broadcast_to(ys_start, ys.shape)
    steps = jnp.broadcast_to(
        jnp.arange(0, n_tokens - 1, dtype=jnp.float32)[None, :], ys.shape)
    return ys_start + (ys * (n_tokens - 2) - ys_start * steps) / (n_tokens - 2)


# ------------------------------ ATSBlock fwd ---------------------------------

def ats_block_forward(params, x, n_tokens, policy, n_ref_tokens, num_heads):
    B, N, C = x.shape
    H = num_heads
    hd = C // H
    scale = hd ** -0.5

    # n_tokens bookkeeping (python scalars, same as reference)
    if n_tokens > N:
        n_tokens = N
    if n_tokens <= 1.0:
        n_tokens = n_tokens * N
    if n_tokens < 8:
        n_tokens = 8
    n_tokens = round(n_tokens)
    if N < n_tokens:
        n_tokens = N
    # NOTE: the reference gather/expand is only shape-correct when
    # n_tokens == N; we exercise exactly that configuration.

    raw_x = x

    # ---------------- AdaptiveTokenSampler (attention) ----------------
    # norm1 + qkv + `* policy`, fused in one kernel, bf16 token-major output.
    qkv = fused_linear(x.reshape(B * N, C), params['w_qkv'], params['b_qkv'],
                       gamma=params['norm1_g'], beta=params['norm1_b'],
                       row_scale=policy.reshape(B * N, 1),
                       out_dtype=jnp.bfloat16).reshape(B, N, 3 * C)

    pol_b = policy[:, :, 0][:, None, :]                  # (B, 1, N)
    av_full, attn0, vnorm3 = fused_attention(qkv, pol_b, num_heads=H,
                                             head_dim=hd, scale=scale)
    v_norm = vnorm3[:, :, 0]                             # (B, N) f32

    # --- score assignment step (f32) ---
    sig = jnp.sum(attn0, axis=1) * v_norm                # (B, N)
    sig = sig[:, 1:]
    sig = sig / jnp.sum(sig, axis=1, keepdims=True)
    sorted_scores = jnp.sort(sig, axis=1)
    sorted_indices = jnp.argsort(sig, axis=1)

    # --- inverse transform sampling (XLA glue) ---
    cdf = jnp.cumsum(sorted_scores, axis=1)
    cmin = jnp.min(cdf, axis=1, keepdims=True)
    cmax = jnp.max(cdf, axis=1, keepdims=True)
    ncdf = (cdf - cmin) / (cmax - cmin)
    ys = create_ys(ncdf, n_ref_tokens)[:, :, None]       # (B, R, 1)
    R = ys.shape[1]
    expanded_ys = jnp.broadcast_to(ys, (B, R, R))
    diff_tokens = R - (N - 1)
    padded = jnp.pad(ncdf[:, None, :], ((0, 0), (0, 0), (diff_tokens, 0)))
    tokens_to_pick_ind = jnp.argmin(jnp.abs(expanded_ys - padded),
                                    axis=2) - diff_tokens      # (B, R)

    unique_indices = get_unique_indices(tokens_to_pick_ind, N - 1)[:, :n_tokens - 1]
    keep = (unique_indices != N - 1)                           # (B, nt-1)
    safe_u = jnp.minimum(unique_indices, N - 2)
    src = jnp.take_along_axis(sorted_indices, safe_u, axis=1) + 1   # (B, nt-1)
    mask = keep[:, :, None].astype(jnp.float32)
    src_c = jnp.broadcast_to(src[:, :, None], (B, n_tokens - 1, C))

    # gather raw_x rows (== sort + pad + gather of the reference)
    sel_raw = jnp.take_along_axis(raw_x, src_c, axis=1) * mask
    selected_x = jnp.concatenate([raw_x[:, 0:1], sel_raw], axis=1)   # (B, nt, C)

    # gather (attn @ v) rows (== gathering attention rows then @ v), bf16
    sel_av = jnp.take_along_axis(av_full, src_c, axis=1) * mask.astype(av_full.dtype)
    av_sel = jnp.concatenate([av_full[:, 0:1], sel_av], axis=1)      # (B, nt, C)
    # TODO(synk): fuse this gather into the proj linear via
    # PrefetchScalarGridSpec + pl.Element row-gather so av_sel never hits HBM.

    new_policy = jnp.pad(mask, ((0, 0), (1, 0), (0, 0)),
                         constant_values=1.0)                        # (B, nt, 1)
    # TODO(synk): sampler = torch.nonzero(policy) has a data-dependent shape;
    # only consumed when drop_tokens=True, which is not exercised here.

    # output projection with `* policy` fused into the epilogue
    x_out = fused_linear(av_sel.reshape(B * n_tokens, C),
                         params['w_proj'], params['b_proj'],
                         row_scale=new_policy.reshape(B * n_tokens, 1)
                         ).reshape(B, n_tokens, C)

    # ---------------- residual + MLP ----------------
    x1 = (selected_x + x_out) * new_policy
    # norm2 + fc1 + GELU fused, bf16 hidden activation
    h = fused_linear(x1.reshape(B * n_tokens, C), params['w_fc1'], params['b_fc1'],
                     gamma=params['norm2_g'], beta=params['norm2_b'],
                     act="gelu", out_dtype=jnp.bfloat16)
    out = fused_linear(h, params['w_fc2'], params['b_fc2']).reshape(B, n_tokens, C)
    x2 = (x1 + out) * new_policy
    return x2, new_policy


# ---------------------------------- main -------------------------------------

if __name__ == "__main__":
    B, N, C, H = 2, 16, 32, 4
    hidden = int(C * 4.0)

    key = jax.random.PRNGKey(0)
    kx, k0, k1, k2, k3, k4, k5, k6 = jax.random.split(key, 8)

    # Linear weights stored already transposed to (in_features, out_features).
    params = {
        'norm1_g': jnp.ones((C,), jnp.float32),
        'norm1_b': jnp.zeros((C,), jnp.float32),
        'w_qkv': 0.02 * jax.random.normal(k0, (C, 3 * C), jnp.float32),
        'b_qkv': jnp.zeros((3 * C,), jnp.float32),          # qkv_bias=False
        'w_proj': 0.02 * jax.random.normal(k1, (C, C), jnp.float32),
        'b_proj': 0.02 * jax.random.normal(k2, (C,), jnp.float32),
        'norm2_g': jnp.ones((C,), jnp.float32),
        'norm2_b': jnp.zeros((C,), jnp.float32),
        'w_fc1': 0.02 * jax.random.normal(k3, (C, hidden), jnp.float32),
        'b_fc1': 0.02 * jax.random.normal(k4, (hidden,), jnp.float32),
        'w_fc2': 0.02 * jax.random.normal(k5, (hidden, C), jnp.float32),
        'b_fc2': 0.02 * jax.random.normal(k6, (C,), jnp.float32),
    }

    x = jax.random.normal(kx, (B, N, C), jnp.float32)
    policy = jnp.ones((B, N, 1), jnp.float32)
    n_tokens = float(N)        # keeps the reference gather/expand shapes valid
    n_ref_tokens = N

    y, pol = ats_block_forward(params, x, n_tokens, policy, n_ref_tokens,
                               num_heads=H)
    jax.block_until_ready((y, pol))
    assert y.shape == (B, N, C) and pol.shape == (B, N, 1)
    assert bool(jnp.all(jnp.isfinite(y)))
    print("KERNEL_OK")
</pallas_src>

<mosaic_0001>
module attributes {stable_mosaic.version = 11 : i64} {
  func.func @_linear_kernel(%arg0: i32, %arg1: memref<32x32xf32, #tpu.memory_space<vmem>>, %arg2: memref<32x96xbf16, #tpu.memory_space<vmem>>, %arg3: memref<1x96xf32, #tpu.memory_space<vmem>>, %arg4: memref<1x32xf32, #tpu.memory_space<vmem>>, %arg5: memref<1x32xf32, #tpu.memory_space<vmem>>, %arg6: memref<32x1xf32, #tpu.memory_space<vmem>>, %arg7: memref<32x96xbf16, #tpu.memory_space<vmem>>) attributes {dimension_semantics = [#tpu.dimension_semantics<parallel>], iteration_bounds = array<i64: 1>, scalar_prefetch = 0 : i64, scratch_operands = 0 : i64, tpu.core_type = #tpu.core_type<tc>, window_params = [{transform_indices = @transform_0, window_bounds = array<i64: 32, 32>}, {pipeline_mode = #tpu.pipeline_mode<synchronous>, transform_indices = @transform_1, window_bounds = array<i64: 32, 96>}, {pipeline_mode = #tpu.pipeline_mode<synchronous>, transform_indices = @transform_2, window_bounds = array<i64: 1, 96>}, {pipeline_mode = #tpu.pipeline_mode<synchronous>, transform_indices = @transform_3, window_bounds = array<i64: 1, 32>}, {pipeline_mode = #tpu.pipeline_mode<synchronous>, transform_indices = @transform_4, window_bounds = array<i64: 1, 32>}, {transform_indices = @transform_5, window_bounds = array<i64: 32, 1>}, {transform_indices = @transform_6, window_bounds = array<i64: 32, 96>}]} {
    %c0 = arith.constant 0 : index
    %c0_0 = arith.constant 0 : index
    %0 = vector.load %arg1[%c0, %c0_0] : memref<32x32xf32, #tpu.memory_space<vmem>>, vector<32x32xf32>
    %cst = arith.constant dense<0.000000e+00> : vector<32xf32>
    %1 = vector.multi_reduction <add>, %0, %cst [1] : vector<32x32xf32> to vector<32xf32>
    %2 = vector.shape_cast %1 : vector<32xf32> to vector<32x1xf32>
    %cst_1 = arith.constant 3.200000e+01 : f32
    %3 = vector.broadcast %cst_1 : f32 to vector<32x1xf32>
    %4 = arith.divf %2, %3 : vector<32x1xf32>
    %5 = vector.broadcast %4 : vector<32x1xf32> to vector<32x32xf32>
    %6 = arith.subf %0, %5 : vector<32x32xf32>
    %7 = arith.mulf %6, %6 : vector<32x32xf32>
    %cst_2 = arith.constant dense<0.000000e+00> : vector<32xf32>
    %8 = vector.multi_reduction <add>, %7, %cst_2 [1] : vector<32x32xf32> to vector<32xf32>
    %9 = vector.shape_cast %8 : vector<32xf32> to vector<32x1xf32>
    %cst_3 = arith.constant 3.200000e+01 : f32
    %10 = vector.broadcast %cst_3 : f32 to vector<32x1xf32>
    %11 = arith.divf %9, %10 : vector<32x1xf32>
    %12 = vector.broadcast %4 : vector<32x1xf32> to vector<32x32xf32>
    %13 = arith.subf %0, %12 : vector<32x32xf32>
    %cst_4 = arith.constant 9.99999974E-6 : f32
    %14 = vector.broadcast %cst_4 : f32 to vector<32x1xf32>
    %15 = arith.addf %11, %14 : vector<32x1xf32>
    %16 = math.rsqrt %15 : vector<32x1xf32>
    %17 = vector.broadcast %16 : vector<32x1xf32> to vector<32x32xf32>
    %18 = arith.mulf %13, %17 : vector<32x32xf32>
    %c0_5 = arith.constant 0 : index
    %c0_6 = arith.constant 0 : index
    %19 = vector.load %arg4[%c0_5, %c0_6] : memref<1x32xf32, #tpu.memory_space<vmem>>, vector<1x32xf32>
    %20 = vector.broadcast %19 : vector<1x32xf32> to vector<32x32xf32>
    %21 = arith.mulf %18, %20 : vector<32x32xf32>
    %c0_7 = arith.constant 0 : index
    %c0_8 = arith.constant 0 : index
    %22 = vector.load %arg5[%c0_7, %c0_8] : memref<1x32xf32, #tpu.memory_space<vmem>>, vector<1x32xf32>
    %23 = vector.broadcast %22 : vector<1x32xf32> to vector<32x32xf32>
    %24 = arith.addf %21, %23 : vector<32x32xf32>
    %25 = arith.truncf %24 : vector<32x32xf32> to vector<32x32xbf16>
    %c0_9 = arith.constant 0 : index
    %c0_10 = arith.constant 0 : index
    %26 = vector.load %arg2[%c0_9, %c0_10] : memref<32x96xbf16, #tpu.memory_space<vmem>>, vector<32x96xbf16>
    %cst_11 = arith.constant dense<0.000000e+00> : vector<32x96xf32>
    %27 = tpu.matmul %25, %26, %cst_11 {dimension_numbers = #tpu.dot_dimension_numbers<[1], [0], [0], [1], [0, 0, 1, 1], [], []>} : vector<32x32xbf16>, vector<32x96xbf16>, vector<32x96xf32> -> vector<32x96xf32>
    %c0_12 = arith.constant 0 : index
    %c0_13 = arith.constant 0 : index
    %28 = vector.load %arg3[%c0_12, %c0_13] : memref<1x96xf32, #tpu.memory_space<vmem>>, vector<1x96xf32>
    %29 = vector.broadcast %28 : vector<1x96xf32> to vector<32x96xf32>
    %30 = arith.addf %27, %29 : vector<32x96xf32>
    %c0_14 = arith.constant 0 : index
    %c0_15 = arith.constant 0 : index
    %31 = vector.load %arg6[%c0_14, %c0_15] : memref<32x1xf32, #tpu.memory_space<vmem>>, vector<32x1xf32>
    %32 = vector.broadcast %31 : vector<32x1xf32> to vector<32x96xf32>
    %33 = arith.mulf %30, %32 : vector<32x96xf32>
    %34 = arith.truncf %33 : vector<32x96xf32> to vector<32x96xbf16>
    %c0_16 = arith.constant 0 : index
    %c0_17 = arith.constant 0 : index
    %35 = vector.load %arg7[%c0_16, %c0_17] : memref<32x96xbf16, #tpu.memory_space<vmem>>, vector<32x96xbf16>
    tpu.vector_store %arg7[%c0_16, %c0_17], %34 {strides = array<i32>} : memref<32x96xbf16, #tpu.memory_space<vmem>>, vector<32x96xbf16>,
    return
  }
  func.func @transform_0(%arg0: i32) -> (i32, i32) {
    %c0_i32 = arith.constant 0 : i32
    %c0_i32_0 = arith.constant 0 : i32
    return %arg0, %c0_i32 : i32, i32
  }
  func.func @transform_1(%arg0: i32) -> (i32, i32) {
    %c0_i32 = arith.constant 0 : i32
    %c0_i32_0 = arith.constant 0 : i32
    %c0_i32_1 = arith.constant 0 : i32
    return %c0_i32, %c0_i32_0 : i32, i32
  }
  func.func @transform_2(%arg0: i32) -> (i32, i32) {
    %c0_i32 = arith.constant 0 : i32
    %c0_i32_0 = arith.constant 0 : i32
    %c0_i32_1 = arith.constant 0 : i32
    return %c0_i32, %c0_i32_0 : i32, i32
  }
  func.func @transform_3(%arg0: i32) -> (i32, i32) {
    %c0_i32 = arith.constant 0 : i32
    %c0_i32_0 = arith.constant 0 : i32
    %c0_i32_1 = arith.constant 0 : i32
    return %c0_i32, %c0_i32_0 : i32, i32
  }
  func.func @transform_4(%arg0: i32) -> (i32, i32) {
    %c0_i32 = arith.constant 0 : i32
    %c0_i32_0 = arith.constant 0 : i32
    %c0_i32_1 = arith.constant 0 : i32
    return %c0_i32, %c0_i32_0 : i32, i32
  }
  func.func @transform_5(%arg0: i32) -> (i32, i32) {
    %c0_i32 = arith.constant 0 : i32
    %c0_i32_0 = arith.constant 0 : i32
    return %arg0, %c0_i32 : i32, i32
  }
  func.func @transform_6(%arg0: i32) -> (i32, i32) {
    %c0_i32 = arith.constant 0 : i32
    %c0_i32_0 = arith.constant 0 : i32
    return %arg0, %c0_i32 : i32, i32
  }
}

</mosaic_0001>

<bundles_post_ra>
// kernel: tpu_custom_call.1
= control target key start
LH: loop header
LB: loop body
LE: loop exit
PB: predicated region body
PF: predicated region fallthrough
CT: control target
= control target key end

     0   :  { %11 = vsyncpa [#allocation3], 0  ;;  %s698_s0 = inlined_call_operand.hbm [shape: f32[32,32], index: 0, kind: input, shape index: {}]   ;;  %s699_s1 = inlined_call_operand.hbm [shape: bf16[32,96], index: 1, kind: input, shape index: {}]   ;;  %s700_s2 = inlined_call_operand.hbm [shape: f32[1,96], index: 2, kind: input, shape index: {}]   ;;  %s701_s3 = inlined_call_operand.hbm [shape: f32[1,32], index: 3, kind: input, shape index: {}]   ;;  %s702_s4 = inlined_call_operand.hbm [shape: f32[1,32], index: 4, kind: input, shape index: {}]   ;;  %s703_s5 = inlined_call_operand.hbm [shape: f32[32,1], index: 5, kind: input, shape index: {}]   ;;  %s704_s6 = inlined_call_operand.hbm [shape: bf16[32,96], index: 6, kind: output, shape index: {}]  }
   0x1   :  { %12 = vsyncpa [#allocation6], 0 }
   0x2   :  { %13 = vsyncpa [#allocation9], 0 }
   0x3   :  { %14 = vsyncpa [#allocation12], 0 }
   0x4   :  { %15 = vsyncpa [#allocation4], 0  ;;  %s545_s21 = smov [#allocation5]   ;;  %s381_s25 = scalar_lea.hbm %s699_s1, 256 }
   0x5   :  { %s33_s22 = sshll.u32 %s545_s21, 4  ;;  %p382_p0 = scmp.ne.s32.totalorder %s699_s1, %s381_s25  ;;  %s34_s22 = int_to_ptr.vmem [resolvable:$true] %s33_s22 }
   0x6   :  { %p385_p1 = scmp.lt.u32.totalorder %s381_s25, %s699_s1 }
   0x8   :  { %p387_p2 = pnand %p385_p1, %p382_p0 }
   0xa   :  { %390 = shalt.err (!%p387_p2)
}
   0xb   :  { %s391_s30 = scalar_lea.vmem %s34_s22, 256  ;;  %p396_p4 = scmp.lt.s32.totalorder %s34_s22, %s34_s22 }
   0xc   :  { %p392_p3 = scmp.ne.s32.totalorder %s34_s22, %s391_s30  ;;  %p397_p5 = scmp.lt.s32.totalorder %s391_s30, %s391_s30 }
   0xe   :  { %p398_p6 = por %p397_p5, %p396_p4 }
  0x10   :  { %p399_p7 = pnand %p398_p6, %p392_p3 }
  0x12   :  { %402 = shalt.err (!%p399_p7)
}
  0x13   :  { %s546_s7 = smov 64   ;;  %s547_s8 = smov 4  }
  0x14   :  { %39 = dma.hbm_to_vmem [thread:$0]  %s699_s1, 256, %s34_s22, [#allocation6], %s546_s7, %s546_s7, %s547_s8  }
  0x15   :  { %s548_s11 = smov [#allocation8]   ;;  %s549_s13 = smov [#allocation2]  }
  0x16   :  { %s56_s12 = sshll.u32 %s548_s11, 4  ;;  %s21_s14 = sshll.u32 %s549_s13, 4  ;;  %s57_s12 = int_to_ptr.vmem [resolvable:$true] %s56_s12  ;;  %s22_s14 = int_to_ptr.vmem [resolvable:$true] %s21_s14 }
  0x17   :  { %s403_s17 = scalar_lea.hbm %s701_s3, 16 }
  0x18   :  { %p404_p8 = scmp.ne.s32.totalorder %s701_s3, %s403_s17  ;;  %p407_p9 = scmp.lt.u32.totalorder %s403_s17, %s701_s3 }
  0x1a   :  { %p409_p10 = pnand %p407_p9, %p404_p8 }
  0x1c   :  { %412 = shalt.err (!%p409_p10)
}
  0x1d   :  { %s413_s1 = scalar_lea.vmem %s57_s12, 16  ;;  %s417_s22 = scalar_lea.vmem %s57_s12, 32 }
  0x1e   :  { %p414_p11 = scmp.ne.s32.totalorder %s57_s12, %s413_s1  ;;  %p418_p12 = scmp.lt.s32.totalorder %s57_s12, %s57_s12 }
  0x1f   :  { %p419_p13 = scmp.lt.s32.totalorder %s417_s22, %s413_s1 }
  0x21   :  { %p420_p0 = por %p419_p13, %p418_p12 }
  0x23   :  { %p421_p1 = pnand %p420_p0, %p414_p11 }
  0x25   :  { %424 = shalt.err (!%p421_p1)
}
  0x26   :  { %59 = dma.hbm_to_vmem [thread:$0]  %s701_s3, 16, %s57_s12, [#allocation9]  }
  0x27   :  { %s425_s27 = scalar_lea.hbm %s698_s0, 512 }
  0x28   :  { %p426_p2 = scmp.ne.s32.totalorder %s698_s0, %s425_s27  ;;  %p429_p3 = scmp.lt.u32.totalorder %s425_s27, %s698_s0 }
  0x2a   :  { %p431_p4 = pnand %p429_p3, %p426_p2 }
  0x2c   :  { %434 = shalt.err (!%p431_p4)
}
  0x2d   :  { %s435_s10 = scalar_lea.vmem %s22_s14, 512  ;;  %p440_p6 = scmp.lt.s32.totalorder %s22_s14, %s22_s14 }
  0x2e   :  { %p436_p5 = scmp.ne.s32.totalorder %s22_s14, %s435_s10  ;;  %p441_p7 = scmp.lt.s32.totalorder %s435_s10, %s435_s10 }
  0x30   :  { %p442_p8 = por %p441_p7, %p440_p6 }
  0x32   :  { %p443_p9 = pnand %p442_p8, %p436_p5 }
  0x34   :  { %446 = shalt.err (!%p443_p9)
}
  0x35   :  { %s550_s3 = smov 128   ;;  %s551_s11 = smov 8  }
  0x36   :  { %27 = dma.hbm_to_vmem [thread:$0]  %s698_s0, 512, %s22_s14, [#allocation3], %s550_s3, %s550_s3, %s551_s11  }
  0x37   :  { %s552_s15 = smov [#allocation7]   ;;  %s553_s17 = smov [#allocation10]  }
  0x38   :  { %s46_s16 = sshll.u32 %s552_s15, 4  ;;  %s66_s18 = sshll.u32 %s553_s17, 4  ;;  %s47_s16 = int_to_ptr.vmem [resolvable:$true] %s46_s16  ;;  %s67_s18 = int_to_ptr.vmem [resolvable:$true] %s66_s18 }
  0x39   :  { %s447_s21 = scalar_lea.hbm %s700_s2, 16 }
  0x3a   :  { %p448_p10 = scmp.ne.s32.totalorder %s700_s2, %s447_s21  ;;  %p451_p11 = scmp.lt.u32.totalorder %s447_s21, %s700_s2 }
  0x3c   :  { %p453_p12 = pnand %p451_p11, %p448_p10 }
  0x3e   :  { %456 = shalt.err (!%p453_p12)
}
  0x3f   :  { %s457_s0 = scalar_lea.vmem %s47_s16, 16  ;;  %s461_s14 = scalar_lea.vmem %s47_s16, 32 }
  0x40   :  { %p458_p13 = scmp.ne.s32.totalorder %s47_s16, %s457_s0  ;;  %p462_p0 = scmp.lt.s32.totalorder %s47_s16, %s47_s16 }
  0x41   :  { %p463_p1 = scmp.lt.s32.totalorder %s461_s14, %s457_s0 }
  0x43   :  { %p464_p2 = por %p463_p1, %p462_p0 }
  0x45   :  { %p465_p3 = pnand %p464_p2, %p458_p13 }
  0x47   :  { %468 = shalt.err (!%p465_p3)
}
  0x48   :  { %49 = dma.hbm_to_vmem [thread:$0]  %s700_s2, 16, %s47_s16, [#allocation6]  }
  0x49   :  { %s469_s29 = scalar_lea.hbm %s702_s4, 16 }
  0x4a   :  { %p470_p4 = scmp.ne.s32.totalorder %s702_s4, %s469_s29  ;;  %p473_p5 = scmp.lt.u32.totalorder %s469_s29, %s702_s4 }
  0x4c   :  { %p475_p6 = pnand %p473_p5, %p470_p4 }
  0x4e   :  { %478 = shalt.err (!%p475_p6)
}
  0x4f   :  { %s479_s13 = scalar_lea.vmem %s67_s18, 16  ;;  %s483_s15 = scalar_lea.vmem %s67_s18, 32 }
  0x50   :  { %p480_p7 = scmp.ne.s32.totalorder %s67_s18, %s479_s13  ;;  %p484_p8 = scmp.lt.s32.totalorder %s67_s18, %s67_s18 }
  0x51   :  { %p485_p9 = scmp.lt.s32.totalorder %s483_s15, %s479_s13 }
  0x53   :  { %p486_p10 = por %p485_p9, %p484_p8 }
  0x55   :  { %p487_p11 = pnand %p486_p10, %p480_p7 }
  0x57   :  { %490 = shalt.err (!%p487_p11)
}
  0x58   :  { %69 = dma.hbm_to_vmem [thread:$0]  %s702_s4, 16, %s67_s18, [#allocation9]  }
  0x59   :  { %s554_s17 = smov [#allocation11]   ;;  %s491_s1 = scalar_lea.hbm %s703_s5, 512 }
  0x5a   :  { %s75_s19 = sshll.u32 %s554_s17, 4  ;;  %p492_p12 = scmp.ne.s32.totalorder %s703_s5, %s491_s1  ;;  %s76_s19 = int_to_ptr.vmem [resolvable:$true] %s75_s19 }
  0x5b   :  { %p495_p13 = scmp.lt.u32.totalorder %s491_s1, %s703_s5 }
  0x5d   :  { %p497_p0 = pnand %p495_p13, %p492_p12 }
  0x5f   :  { %500 = shalt.err (!%p497_p0)
}
  0x60   :  { %s501_s14 = scalar_lea.vmem %s76_s19, 512  ;;  %p506_p2 = scmp.lt.s32.totalorder %s76_s19, %s76_s19 }
  0x61   :  { %p502_p1 = scmp.ne.s32.totalorder %s76_s19, %s501_s14  ;;  %p507_p3 = scmp.lt.s32.totalorder %s501_s14, %s501_s14 }
  0x63   :  { %p508_p4 = por %p507_p3, %p506_p2 }
  0x65   :  { %p509_p5 = pnand %p508_p4, %p502_p1 }
  0x67   :  { %512 = shalt.err (!%p509_p5)
}
  0x68   :  { %81 = dma.hbm_to_vmem [thread:$0]  %s703_s5, 512, %s76_s19, [#allocation12], %s550_s3, %s550_s3, %s551_s11  }
  0x69   :  { %535 = dma.done.wait [#allocation3], 512  }
  0x6a   :  { %536 = vsyncadd [#allocation3], 4294966784 }
  0x6b   :  { %537 = dma.done.wait [#allocation6], 272  }
  0x6c   :  { %538 = vsyncadd [#allocation6], 4294967024 }
  0x6d   :  { %539 = dma.done.wait [#allocation9], 32  }
  0x6e   :  { %540 = vsyncadd [#allocation9], 4294967264 }
  0x6f   :  { %541 = dma.done.wait [#allocation12], 512  }
  0x70   :  { %542 = vsyncadd [#allocation12], 4294966784  ;;  %vm105_vm0 = vcmask 261120   ;;  %v101_v0 = vld [vmem:[#allocation2] sm:$0xff]  ;;  %v103_v1 = vld [vmem:[#allocation2 + $0x10] sm:$0xff]  ;;  %v555_v31 = vmov 0  }
  0x71   :  { %v102_v2 = vld [vmem:[#allocation2 + $0x8] sm:$0xff]  ;;  %v106_v3 = vsel %vm105_vm0, %v101_v0, 0.0  ;;  %v112_v4 = vsel %vm105_vm0, %v103_v1, 0.0  ;;  %v104_v5 = vld [vmem:[#allocation2 + $0x18] sm:$0xff]  ;;  %v371_v28 = vld [vmem:[#allocation5] sm:$0xff]   ;;  %370 = vset.pattern.permute.xlu1 %v555_v31  ;;  %369 = vset.pattern.permute.xlu0 %v555_v31  ;;  %vm305_vm1 = vcmask 781312  }
  0x72   :  { %107 = vadd.xlane.f32.xlu0 %v106_v3  ;;  %113 = vadd.xlane.f32.xlu1 %v112_v4  ;;  %v109_v6 = vsel %vm105_vm0, %v102_v2, 0.0  ;;  %v115_v7 = vsel %vm105_vm0, %v104_v5, 0.0  ;;  %v372_v29 = vld [vmem:[#allocation5 + $0x8] sm:$0xff]   ;;  %v262_v30 = vld [vmem:[#allocation11 + $0x8] sm:$0xff]  ;;  %v261_v32 = vld [vmem:[#allocation11] sm:$0xff]  ;;  %s556_s5 = smov [#allocation13]  }
  0x73   :  { %349 = vmatprep.subr.bf16.mxu0 %v371_v28  ;;  %v263_v33 = vld [vmem:[#allocation11 + $0x10] sm:$0xff]  ;;  %v264_v34 = vld [vmem:[#allocation11 + $0x18] sm:$0xff]  ;;  %s315_s3 = sshll.u32 %s556_s5, 4  ;;  %s316_s3 = int_to_ptr.vmem [resolvable:$true] %s315_s3 }
  0x74   :  { %350 = vmatpush3.bf16.msra.mxu0 %v371_v28  ;;  %v330_v49 = vld [vmem:[#allocation8] ss:$0 sm:$0xff]  ;;  %v331_v55 = vld [vmem:[#allocation10] ss:$0 sm:$0xff]  ;;  %s513_s11 = scalar_lea.vmem %s316_s3, 256  ;;  %p518_p7 = scmp.lt.s32.totalorder %s316_s3, %s316_s3 }
  0x75   :  { %351 = vmatprep.subr.bf16.mxu0 %v372_v29  ;;  %p514_p6 = scmp.ne.s32.totalorder %s316_s3, %s513_s11  ;;  %p519_p8 = scmp.lt.s32.totalorder %s513_s11, %s513_s11 }
  0x76   :  { %110 = vadd.xlane.f32.xlu0 %v109_v6  ;;  %116 = vadd.xlane.f32.xlu1 %v115_v7 }
  0x77   :  { %p520_p9 = por %p519_p8, %p518_p7 }
  0x78   :  { %352 = vmatpush3.bf16.msra.mxu0 %v372_v29 }
  0x79   :  { %p521_p10 = pnand %p520_p9, %p514_p6 }
  0xff   :  { %v108_v8 = vpop.xlane.xlu0 %107  ;;  %v114_v9 = vpop.xlane.xlu1 %113 }
 0x100   :  { %v119_v10 = vmul.f32 0.03125, %v108_v8  ;;  %v121_v11 = vmul.f32 0.03125, %v114_v9 }
 0x102   :  { %v123_v12 = vsub.f32 %v101_v0, %v119_v10  ;;  %v125_v13 = vsub.f32 %v103_v1, %v121_v11 }
 0x103   :  { %v111_v14 = vpop.xlane.xlu0 %110  ;;  %v117_v15 = vpop.xlane.xlu1 %116 }
 0x104   :  { %v120_v16 = vmul.f32 0.03125, %v111_v14  ;;  %v122_v17 = vmul.f32 0.03125, %v117_v15  ;;  %v127_v18 = vmul.f32 %v123_v12, %v123_v12  ;;  %v129_v19 = vmul.f32 %v125_v13, %v125_v13 }
 0x106   :  { %v124_v20 = vsub.f32 %v102_v2, %v120_v16  ;;  %v126_v21 = vsub.f32 %v104_v5, %v122_v17  ;;  %v131_v22 = vsel %vm105_vm0, %v127_v18, 0.0  ;;  %v137_v23 = vsel %vm105_vm0, %v129_v19, 0.0  ;;  %v332_v5 = vld [vmem:[#allocation7] ss:$0 sm:$0xff] }
 0x107   :  { %132 = vadd.xlane.f32.xlu0 %v131_v22 }
 0x108   :  { %v128_v24 = vmul.f32 %v124_v20, %v124_v20  ;;  %v130_v25 = vmul.f32 %v126_v21, %v126_v21 }
 0x10a   :  { %v134_v26 = vsel %vm105_vm0, %v128_v24, 0.0  ;;  %v140_v27 = vsel %vm105_vm0, %v130_v25, 0.0 }
 0x10b   :  { %138 = vadd.xlane.f32.xlu0 %v137_v23  ;;  %135 = vadd.xlane.f32.xlu1 %v134_v26 }
 0x10f   :  { %141 = vadd.xlane.f32.xlu1 %v140_v27 }
 0x120   :  { %272 = vperm.xlu1 %370, %v262_v30  }
 0x121   :  { %267 = vperm.xlu0 %369, %v261_v32  }
 0x124   :  { %277 = vperm.xlu1 %370, %v263_v33  }
 0x128   :  { %282 = vperm.xlu1 %370, %v264_v34  }
 0x194   :  { %v133_v35 = vpop.xlane.xlu0 %132 }
 0x195   :  { %v143_v36 = vmul.f32 0.03125, %v133_v35 }
 0x197   :  { %v147_v37 = vadd.f32 1e-05, %v143_v36 }
 0x198   :  { %v136_v38 = vpop.xlane.xlu1 %135  ;;  %v139_v39 = vpop.xlane.xlu0 %138 }
 0x199   :  { %373 = vrsqrt.f32 %v147_v37  ;;  %v144_v40 = vmul.f32 0.03125, %v136_v38  ;;  %v145_v41 = vmul.f32 0.03125, %v139_v39 }
 0x19b   :  { %v148_v42 = vadd.f32 1e-05, %v144_v40  ;;  %v149_v43 = vadd.f32 1e-05, %v145_v41 }
 0x19c   :  { %v142_v44 = vpop.xlane.xlu1 %141 }
 0x19d   :  { %375 = vrsqrt.f32 %v148_v42  ;;  %v146_v45 = vmul.f32 0.03125, %v142_v44 }
 0x19e   :  { %377 = vrsqrt.f32 %v149_v43 }
 0x19f   :  { %v150_v46 = vadd.f32 1e-05, %v146_v45 }
 0x1a0   :  { %v273_v3 = vpop.permute.xlu1 %272  ;;  %v268_v9 = vpop.permute.xlu0 %267 }
 0x1a1   :  { %379 = vrsqrt.f32 %v150_v46 }
 0x1a3   :  { %v374_v47 = vpop.eup %373 }
 0x1a4   :  { %v155_v48 = vmul.f32 %v374_v47, %v123_v12  ;;  %v278_v4 = vpop.permute.xlu1 %277 }
 0x1a6   :  { %v166_v53 = vmul.f32 %v330_v49, %v155_v48 }
 0x1a7   :  { %v376_v50 = vpop.eup %375 }
 0x1a8   :  { %v378_v51 = vpop.eup %377  ;;  %v156_v52 = vmul.f32 %v376_v50, %v124_v20  ;;  %v177_v59 = vadd.f32 %v331_v55, %v166_v53  ;;  %v283_v15 = vpop.permute.xlu1 %282 }
 0x1a9   :  { %v157_v54 = vmul.f32 %v378_v51, %v125_v13 }
 0x1aa   :  { %v167_v56 = vmul.f32 %v330_v49, %v156_v52 }
 0x1ab   :  { %v380_v57 = vpop.eup %379  ;;  %v168_v61 = vmul.f32 %v330_v49, %v157_v54 }
 0x1ac   :  { %v158_v58 = vmul.f32 %v380_v57, %v126_v21  ;;  %v178_v60 = vadd.f32 %v331_v55, %v167_v56 }
 0x1ad   :  { %v179_v0 = vadd.f32 %v331_v55, %v168_v61 }
 0x1ae   :  { %v181_v62 = vpack.c.bf16 %v178_v60, %v177_v59  ;;  %v169_v63 = vmul.f32 %v330_v49, %v158_v58 }
 0x1b0   :  { %353 = vmatprep.mubr.msk.bf16.mxu0 %vm105_vm0, %v181_v62  ;;  %v180_v1 = vadd.f32 %v331_v55, %v169_v63 }
 0x1b2   :  { %v182_v2 = vpack.c.bf16 %v180_v1, %v179_v0 }
 0x1b4   :  { %354 = vmatmul.mubr.msk.bf16.vlgmr.msra.gmra.mrb[0].mxu0 %vm105_vm0, %v182_v2 }
 0x287   :  { %v355_v6 = vpop.f32.mrb[0].mxu0 }
 0x288   :  { %v255_v7 = vadd.f32 %v355_v6, %v332_v5  ;;  %v246_v8 = vpop.f32.mrb[1].mxu0 }
 0x289   :  { %v247_v10 = vadd.f32 %v332_v5, %v246_v8  ;;  %v356_v11 = vpop.f32.mrb[2].mxu0 }
 0x28a   :  { %v287_v12 = vmul.f32 %v278_v4, %v255_v7  ;;  %v258_v13 = vadd.f32 %v356_v11, %v332_v5  ;;  %v249_v14 = vpop.f32.mrb[3].mxu0 }
 0x28b   :  { %v250_v16 = vadd.f32 %v332_v5, %v249_v14  ;;  %v285_v17 = vmul.f32 %v268_v9, %v247_v10 }
 0x28c   :  { %v343_v18 = vpack.c.bf16 %v287_v12, %v287_v12  ;;  %v288_v19 = vmul.f32 %v283_v15, %v258_v13 }
 0x28d   :  { %v286_v20 = vmul.f32 %v273_v3, %v250_v16  ;;  %v341_v21 = vpack.c.bf16 %v285_v17, %v285_v17 }
 0x28e   :  { %308 = vst.msk [vmem:[#allocation13 + $0x8] sm:$0xf] %vm305_vm1, %v343_v18  ;;  %v344_v22 = vpack.c.bf16 %v288_v19, %v288_v19 }
 0x28f   :  { %v342_v23 = vpack.c.bf16 %v286_v20, %v286_v20  ;;  %306 = vst.msk [vmem:[#allocation13] sm:$0xf] %vm305_vm1, %v341_v21 }
 0x290   :  { %309 = vst.msk [vmem:[#allocation13 + $0xc] sm:$0xf] %vm305_vm1, %v344_v22 }
 0x291   :  { %307 = vst.msk [vmem:[#allocation13 + $0x4] sm:$0xf] %vm305_vm1, %v342_v23 }
 0x292   :  { %524 = shalt.err (!%p521_p10)
}
 0x293   :  { %s525_s27 = scalar_lea.hbm %s704_s6, 256 }
 0x294   :  { %p526_p11 = scmp.ne.s32.totalorder %s704_s6, %s525_s27  ;;  %p529_p12 = scmp.lt.u32.totalorder %s525_s27, %s704_s6 }
 0x296   :  { %p531_p13 = pnand %p529_p12, %p526_p11 }
 0x298   :  { %534 = shalt.err (!%p531_p13)
}
 0x299   :  { %321 = dma.vmem_to_hbm [thread:$0]  %s316_s3, 256, %s704_s6, [#allocation4], %s546_s7, %s546_s7, %s547_s8  }
 0x29a   :  { %543 = dma.done.wait [#allocation4], 256  }
 0x29b   :  { %544 = vsyncadd [#allocation4], 4294967040 }
 0x29c   :  { %325 = vsyncpa [#allocation3], 1 }
 0x29d   :  { %326 = vsyncpa [#allocation6], 1 }
 0x29e   :  { %327 = vsyncpa [#allocation9], 1 }
 0x29f   :  { %328 = vsyncpa [#allocation12], 1 }
 0x2a0   :  { %329 = vsyncpa [#allocation4], 1 }

</bundles_post_ra>
